<compile_context>
chip_gen: v5e
topology: v5e:2x2
jax: 0.10.0
libtpu: 0.0.40
codegen_flags: <defaults>
</compile_context>

<pallas_src>
import jax
import jax.numpy as jnp
from jax.experimental import pallas as pl
from jax.experimental.pallas import tpu as pltpu


def _round_up(x, m):
    return ((x + m - 1) // m) * m


def _vmem_capacity_bytes():
    """Best-effort per-core VMEM capacity query with safe fallbacks."""
    try:
        return int(pltpu.get_tpu_info().vmem_capacity_bytes)
    except Exception:
        pass
    try:
        kind = jax.devices()[0].device_kind.lower()
        return (64 << 20) if "v7" in kind else (128 << 20)
    except Exception:
        return 64 << 20  # conservative


def _looks_like_v7():
    try:
        return "v7" in jax.devices()[0].device_kind.lower()
    except Exception:
        return False


# ----------------------------------------------------------------------------
# Kernels
# ----------------------------------------------------------------------------
def _mlp_resident_kernel(x_ref, w1_ref, b1_ref, w2_ref, b2_ref, o_ref):
    """Weights fully VMEM-resident: one fused matmul->relu->matmul per tile."""
    h = jnp.dot(x_ref[...], w1_ref[...], preferred_element_type=jnp.float32)
    h = jnp.maximum(h + b1_ref[...], 0.0)                     # f32 ReLU
    o = jnp.dot(h.astype(w2_ref.dtype), w2_ref[...],
                preferred_element_type=jnp.float32)
    o_ref[...] = (o + b2_ref[...]).astype(o_ref.dtype)


def _mlp_streamed_kernel(x_ref, w1_ref, b1_ref, w2_ref, b2_ref, o_ref, acc_ref):
    """Hidden dim tiled (reduction axis); f32 VMEM accumulator, b2 in init."""
    j = pl.program_id(1)

    @pl.when(j == 0)
    def _():
        acc_ref[...] = jnp.broadcast_to(b2_ref[...], acc_ref.shape)

    h = jnp.dot(x_ref[...], w1_ref[...], preferred_element_type=jnp.float32)
    h = jnp.maximum(h + b1_ref[...], 0.0)
    acc_ref[...] += jnp.dot(h.astype(w2_ref.dtype), w2_ref[...],
                            preferred_element_type=jnp.float32)

    @pl.when(j == pl.num_programs(1) - 1)
    def _():
        o_ref[...] = acc_ref[...].astype(o_ref.dtype)


# ----------------------------------------------------------------------------
# Wrapper / factory
# ----------------------------------------------------------------------------
def make_mlp_forward(w1, b1, w2, b2):
    """One-time prepare: pad + bf16-cast weights, pick VMEM budgets, return a
    jitted forward(x) that calls the Pallas kernel.

    w1: [in, hidden]; b1: [hidden] or [1, hidden];
    w2: [hidden, out]; b2: [out] or [1, out].
    """
    in_size, hidden = w1.shape
    out_size = w2.shape[1]
    hidden_p = _round_up(hidden, 128)
    out_p = _round_up(out_size, 128)

    # --- one-time padding / casting (NOT repeated per forward call) ---------
    # Zero-padded hidden units contribute exactly 0 (b1 pad = 0 -> relu 0,
    # W2 pad rows = 0); padded output columns are sliced off after the call.
    w1p = jnp.pad(w1, ((0, 0), (0, hidden_p - hidden))).astype(jnp.bfloat16)
    b1p = jnp.pad(jnp.reshape(b1, (1, -1)),
                  ((0, 0), (0, hidden_p - hidden))).astype(jnp.float32)
    w2p = jnp.pad(w2, ((0, hidden_p - hidden),
                       (0, out_p - out_size))).astype(jnp.bfloat16)
    b2p = jnp.pad(jnp.reshape(b2, (1, -1)),
                  ((0, 0), (0, out_p - out_size))).astype(jnp.float32)
    w1p, b1p, w2p, b2p = jax.block_until_ready((w1p, b1p, w2p, b2p))

    vmem_cap = _vmem_capacity_bytes()
    small_vmem = vmem_cap <= (64 << 20)          # v7x-class (64 MiB / TC)
    budget = (40 << 20) if small_vmem else (100 << 20)
    vmem_limit = (56 << 20) if small_vmem else (110 << 20)
    two_cores = _looks_like_v7()
    bb_max = 512 if small_vmem else 1024

    @jax.jit
    def _fwd(x, w1p, b1p, w2p, b2p):
        batch = x.shape[0]
        out_dtype = x.dtype
        out_bytes = out_dtype.itemsize
        bf = 2  # bf16

        # --- footprint models (include h temporaries + double buffering) ----
        def resident_fp(bb, bn):
            return (2 * bb * in_size * bf          # x tile (double-buffered)
                    + 2 * in_size * hidden_p * bf  # W1
                    + 2 * hidden_p * 4             # b1 (f32)
                    + 2 * hidden_p * bn * bf       # W2
                    + 2 * bn * 4                   # b2
                    + 2 * bb * bn * out_bytes      # out tile
                    + bb * hidden_p * 4            # h (f32)
                    + bb * hidden_p * bf           # h (bf16 copy)
                    + bb * bn * 4)                 # o (f32 before cast)

        def streamed_fp(bb, bh):
            return (2 * bb * in_size * bf
                    + 2 * in_size * bh * bf
                    + 2 * bh * 4
                    + 2 * bh * out_p * bf
                    + 2 * out_p * 4
                    + 2 * bb * out_p * out_bytes
                    + bb * out_p * 4               # accumulator scratch
                    + bb * bh * 4                  # h (f32)
                    + bb * bh * bf)                # h (bf16)

        # --- batch tile candidates (largest first, 256-aligned for big B) ---
        cands = []
        if batch <= bb_max:
            cands.append(batch)                    # full dim -> always legal
        for bb in (1024, 512, 256, 128, 64, 32, 16, 8):
            if bb <= bb_max and bb < batch:
                cands.append(bb)
        if not cands:
            cands = [batch]

        # --- plan: prefer weight-resident, else stream the hidden dim -------
        plan = None
        for bb in cands:
            if resident_fp(bb, out_p) <= budget:
                plan = ("resident", bb, out_p)
                break
        if plan is None:
            m = hidden_p // 128
            bh_cands = [128 * d for d in range(m, 0, -1) if m % d == 0]
            for bb in cands:
                for bh in bh_cands:
                    if streamed_fp(bb, bh) <= budget:
                        plan = ("streamed", bb, bh)
                        break
                if plan is not None:
                    break
        if plan is None:
            # TODO(synk): extremely large in_size would also need K-tiling of
            # the first matmul; fall back to the smallest streamed config.
            plan = ("streamed", cands[-1], 128)

        mode, block_b, aux = plan

        # --- pad batch so block_b divides it (no partial edge blocks) -------
        xb = x.astype(jnp.bfloat16)
        batch_p = batch if block_b == batch else _round_up(batch, block_b)
        if batch_p != batch:
            xb = jnp.pad(xb, ((0, batch_p - batch), (0, 0)))
        nb = batch_p // block_b

        if mode == "resident":
            # Optional output-column parallelism on v7x when only one batch
            # tile exists (keeps the second TensorCore busy).
            block_n = out_p
            if two_cores and nb == 1 and out_p >= 256 and out_p % 256 == 0:
                block_n = out_p // 2
            nn = out_p // block_n

            cost = pl.CostEstimate(
                flops=2 * batch_p * (nn * in_size * hidden_p
                                     + hidden_p * out_p),
                transcendentals=0,
                bytes_accessed=(xb.size * 2
                                + w1p.size * 2 + w2p.size * 2
                                + b1p.size * 4 + b2p.size * 4
                                + batch_p * out_p * out_bytes),
            )
            out = pl.pallas_call(
                _mlp_resident_kernel,
                out_shape=jax.ShapeDtypeStruct((batch_p, out_p), out_dtype),
                grid_spec=pltpu.PrefetchScalarGridSpec(
                    num_scalar_prefetch=0,
                    grid=(nb, nn),
                    in_specs=[
                        pl.BlockSpec((block_b, in_size), lambda i, n: (i, 0)),
                        pl.BlockSpec((in_size, hidden_p), lambda i, n: (0, 0)),
                        pl.BlockSpec((1, hidden_p), lambda i, n: (0, 0)),
                        pl.BlockSpec((hidden_p, block_n), lambda i, n: (0, n)),
                        pl.BlockSpec((1, block_n), lambda i, n: (0, n)),
                    ],
                    out_specs=pl.BlockSpec((block_b, block_n),
                                           lambda i, n: (i, n)),
                ),
                compiler_params=pltpu.CompilerParams(
                    dimension_semantics=("parallel", "parallel"),
                    vmem_limit_bytes=vmem_limit,
                ),
                cost_estimate=cost,
            )(xb, w1p, b1p, w2p, b2p)
        else:
            block_h = aux
            nh = hidden_p // block_h
            cost = pl.CostEstimate(
                flops=2 * batch_p * (in_size * hidden_p + hidden_p * out_p),
                transcendentals=0,
                # W1/W2/biases are re-streamed once per batch tile.
                bytes_accessed=(xb.size * 2
                                + nb * (w1p.size * 2 + w2p.size * 2
                                        + b1p.size * 4 + b2p.size * 4)
                                + batch_p * out_p * out_bytes),
            )
            out = pl.pallas_call(
                _mlp_streamed_kernel,
                out_shape=jax.ShapeDtypeStruct((batch_p, out_p), out_dtype),
                grid_spec=pltpu.PrefetchScalarGridSpec(
                    num_scalar_prefetch=0,
                    grid=(nb, nh),
                    in_specs=[
                        pl.BlockSpec((block_b, in_size), lambda i, j: (i, 0)),
                        pl.BlockSpec((in_size, block_h), lambda i, j: (0, j)),
                        pl.BlockSpec((1, block_h), lambda i, j: (0, j)),
                        pl.BlockSpec((block_h, out_p), lambda i, j: (j, 0)),
                        pl.BlockSpec((1, out_p), lambda i, j: (0, 0)),
                    ],
                    out_specs=pl.BlockSpec((block_b, out_p),
                                           lambda i, j: (i, 0)),
                    scratch_shapes=[pltpu.VMEM((block_b, out_p), jnp.float32)],
                ),
                compiler_params=pltpu.CompilerParams(
                    dimension_semantics=("parallel", "arbitrary"),
                    vmem_limit_bytes=vmem_limit,
                ),
                cost_estimate=cost,
            )(xb, w1p, b1p, w2p, b2p)

        return out[:batch, :out_size]

    def forward(x):
        return _fwd(x, w1p, b1p, w2p, b2p)

    return forward


# ----------------------------------------------------------------------------
# Init / reference
# ----------------------------------------------------------------------------
def init_mlp_params(key, input_size, hidden_size, output_size,
                    dtype=jnp.float32):
    """Mirrors nn.Linear's U(-1/sqrt(fan_in), 1/sqrt(fan_in)) init.
    Weights stored transposed ([in, out]) relative to torch's [out, in]."""
    k1, k2, k3, k4 = jax.random.split(key, 4)
    bound1 = 1.0 / jnp.sqrt(input_size)
    bound2 = 1.0 / jnp.sqrt(hidden_size)
    w1 = jax.random.uniform(k1, (input_size, hidden_size), dtype, -bound1, bound1)
    b1 = jax.random.uniform(k2, (1, hidden_size), dtype, -bound1, bound1)
    w2 = jax.random.uniform(k3, (hidden_size, output_size), dtype, -bound2, bound2)
    b2 = jax.random.uniform(k4, (1, output_size), dtype, -bound2, bound2)
    return w1, b1, w2, b2


def mlp_reference(x, w1, b1, w2, b2):
    h = jnp.maximum(x @ w1 + b1, 0.0)
    return h @ w2 + b2


if __name__ == "__main__":
    key = jax.random.PRNGKey(0)
    kx, kp = jax.random.split(key)

    batch = 8
    input_size = 32
    hidden_size = 64
    output_size = 16

    x = jax.random.normal(kx, (batch, input_size), dtype=jnp.float32)
    w1, b1, w2, b2 = init_mlp_params(kp, input_size, hidden_size, output_size)

    mlp = make_mlp_forward(w1, b1, w2, b2)   # one-time prepare (pad + bf16)
    out = jax.block_until_ready(mlp(x))

    ref = mlp_reference(x, w1, b1, w2, b2)
    assert out.shape == (batch, output_size)
    # bf16 MXU path -> compare against f32 reference with bf16-level tolerance.
    assert jnp.allclose(out, ref, atol=3e-2, rtol=3e-2), "mismatch vs reference"

    print("KERNEL_OK")
</pallas_src>

<mosaic_0001>
module attributes {stable_mosaic.version = 11 : i64} {
  func.func @_mlp_resident_kernel(%arg0: i32, %arg1: i32, %arg2: memref<8x32xbf16, #tpu.memory_space<vmem>>, %arg3: memref<32x128xbf16, #tpu.memory_space<vmem>>, %arg4: memref<1x128xf32, #tpu.memory_space<vmem>>, %arg5: memref<128x128xbf16, #tpu.memory_space<vmem>>, %arg6: memref<1x128xf32, #tpu.memory_space<vmem>>, %arg7: memref<8x128xf32, #tpu.memory_space<vmem>>) attributes {dimension_semantics = [#tpu.dimension_semantics<parallel>, #tpu.dimension_semantics<parallel>], iteration_bounds = array<i64: 1, 1>, scalar_prefetch = 0 : i64, scratch_operands = 0 : i64, tpu.core_type = #tpu.core_type<tc>, window_params = [{transform_indices = @transform_0, window_bounds = array<i64: 8, 32>}, {pipeline_mode = #tpu.pipeline_mode<synchronous>, transform_indices = @transform_1, window_bounds = array<i64: 32, 128>}, {pipeline_mode = #tpu.pipeline_mode<synchronous>, transform_indices = @transform_2, window_bounds = array<i64: 1, 128>}, {transform_indices = @transform_3, window_bounds = array<i64: 128, 128>}, {transform_indices = @transform_4, window_bounds = array<i64: 1, 128>}, {transform_indices = @transform_5, window_bounds = array<i64: 8, 128>}]} {
    %c0 = arith.constant 0 : index
    %c0_0 = arith.constant 0 : index
    %0 = vector.load %arg2[%c0, %c0_0] : memref<8x32xbf16, #tpu.memory_space<vmem>>, vector<8x32xbf16>
    %c0_1 = arith.constant 0 : index
    %c0_2 = arith.constant 0 : index
    %1 = vector.load %arg3[%c0_1, %c0_2] : memref<32x128xbf16, #tpu.memory_space<vmem>>, vector<32x128xbf16>
    %cst = arith.constant dense<0.000000e+00> : vector<8x128xf32>
    %2 = tpu.matmul %0, %1, %cst {dimension_numbers = #tpu.dot_dimension_numbers<[1], [0], [0], [1], [0, 0, 1, 1], [], []>} : vector<8x32xbf16>, vector<32x128xbf16>, vector<8x128xf32> -> vector<8x128xf32>
    %c0_3 = arith.constant 0 : index
    %c0_4 = arith.constant 0 : index
    %3 = vector.load %arg4[%c0_3, %c0_4] : memref<1x128xf32, #tpu.memory_space<vmem>>, vector<1x128xf32>
    %4 = vector.broadcast %3 : vector<1x128xf32> to vector<8x128xf32>
    %5 = arith.addf %2, %4 : vector<8x128xf32>
    %cst_5 = arith.constant 0.000000e+00 : f32
    %6 = vector.broadcast %cst_5 : f32 to vector<8x128xf32>
    %7 = arith.maximumf %5, %6 : vector<8x128xf32>
    %8 = arith.truncf %7 : vector<8x128xf32> to vector<8x128xbf16>
    %c0_6 = arith.constant 0 : index
    %c0_7 = arith.constant 0 : index
    %9 = vector.load %arg5[%c0_6, %c0_7] : memref<128x128xbf16, #tpu.memory_space<vmem>>, vector<128x128xbf16>
    %cst_8 = arith.constant dense<0.000000e+00> : vector<8x128xf32>
    %10 = tpu.matmul %8, %9, %cst_8 {dimension_numbers = #tpu.dot_dimension_numbers<[1], [0], [0], [1], [0, 0, 1, 1], [], []>} : vector<8x128xbf16>, vector<128x128xbf16>, vector<8x128xf32> -> vector<8x128xf32>
    %c0_9 = arith.constant 0 : index
    %c0_10 = arith.constant 0 : index
    %11 = vector.load %arg6[%c0_9, %c0_10] : memref<1x128xf32, #tpu.memory_space<vmem>>, vector<1x128xf32>
    %12 = vector.broadcast %11 : vector<1x128xf32> to vector<8x128xf32>
    %13 = arith.addf %10, %12 : vector<8x128xf32>
    %c0_11 = arith.constant 0 : index
    %c0_12 = arith.constant 0 : index
    %14 = vector.load %arg7[%c0_11, %c0_12] : memref<8x128xf32, #tpu.memory_space<vmem>>, vector<8x128xf32>
    tpu.vector_store %arg7[%c0_11, %c0_12], %13 {strides = array<i32>} : memref<8x128xf32, #tpu.memory_space<vmem>>, vector<8x128xf32>,
    return
  }
  func.func @transform_0(%arg0: i32, %arg1: i32) -> (i32, i32) {
    %c0_i32 = arith.constant 0 : i32
    %c0_i32_0 = arith.constant 0 : i32
    return %arg0, %c0_i32 : i32, i32
  }
  func.func @transform_1(%arg0: i32, %arg1: i32) -> (i32, i32) {
    %c0_i32 = arith.constant 0 : i32
    %c0_i32_0 = arith.constant 0 : i32
    %c0_i32_1 = arith.constant 0 : i32
    return %c0_i32, %c0_i32_0 : i32, i32
  }
  func.func @transform_2(%arg0: i32, %arg1: i32) -> (i32, i32) {
    %c0_i32 = arith.constant 0 : i32
    %c0_i32_0 = arith.constant 0 : i32
    %c0_i32_1 = arith.constant 0 : i32
    return %c0_i32, %c0_i32_0 : i32, i32
  }
  func.func @transform_3(%arg0: i32, %arg1: i32) -> (i32, i32) {
    %c0_i32 = arith.constant 0 : i32
    %c0_i32_0 = arith.constant 0 : i32
    return %c0_i32, %arg1 : i32, i32
  }
  func.func @transform_4(%arg0: i32, %arg1: i32) -> (i32, i32) {
    %c0_i32 = arith.constant 0 : i32
    %c0_i32_0 = arith.constant 0 : i32
    return %c0_i32, %arg1 : i32, i32
  }
  func.func @transform_5(%arg0: i32, %arg1: i32) -> (i32, i32) {
    %c0_i32 = arith.constant 0 : i32
    return %arg0, %arg1 : i32, i32
  }
}

</mosaic_0001>

<bundles_post_ra>
// kernel: _fwd.1
= control target key start
LH: loop header
LB: loop body
LE: loop exit
PB: predicated region body
PF: predicated region fallthrough
CT: control target
= control target key end

     0   :  { %10 = vsyncpa [#allocation3], 0  ;;  %s383_s0 = inlined_call_operand.vmem [shape: bf16[8,32], index: 0, kind: input, shape index: {}]   ;;  %s384_s1 = inlined_call_operand.hbm [shape: bf16[32,128], index: 1, kind: input, shape index: {}]   ;;  %s385_s2 = inlined_call_operand.vmem [shape: f32[1,128], index: 2, kind: input, shape index: {}]   ;;  %s386_s3 = inlined_call_operand.hbm [shape: bf16[128,128], index: 3, kind: input, shape index: {}]   ;;  %s387_s4 = inlined_call_operand.vmem [shape: f32[1,128], index: 4, kind: input, shape index: {}]   ;;  %s388_s5 = inlined_call_operand.hbm [shape: f32[8,128], index: 5, kind: output, shape index: {}]  }
   0x1   :  { %11 = vsyncpa [#allocation6], 0 }
   0x2   :  { %12 = vsyncpa [#allocation4], 0  ;;  %s19_s20 = sshll.u32 %s384_s1, 4  ;;  %s330_s21 = smov [#allocation2]   ;;  %s20_s20 = int_to_ptr.hbm [resolvable:$true] %s19_s20 }
   0x3   :  { %s21_s22 = sshll.u32 %s330_s21, 4  ;;  %s34_s25 = sshll.u32 %s386_s3, 4  ;;  %s22_s22 = int_to_ptr.vmem [resolvable:$true] %s21_s22  ;;  %s35_s25 = int_to_ptr.hbm [resolvable:$true] %s34_s25 }
   0x4   :  { %s331_s26 = smov 64   ;;  %s332_s27 = smov 4  }
   0x5   :  { %27 = dma.hbm_to_vmem [thread:$0]  %s20_s20, 256, %s22_s22, [#allocation3], %s331_s26, %s331_s26, %s332_s27  }
   0x6   :  { %s333_s28 = smov [#allocation5]  }
   0x7   :  { %s36_s29 = sshll.u32 %s333_s28, 4  ;;  %s37_s29 = int_to_ptr.vmem [resolvable:$true] %s36_s29 }
   0x8   :  { %42 = dma.hbm_to_vmem [thread:$0]  %s35_s25, 1024, %s37_s29, [#allocation6], %s331_s26, %s331_s26, %s332_s27  }
   0x9   :  { %324 = dma.done.wait [#allocation3], 256  }
   0xa   :  { %325 = vsyncadd [#allocation3], 4294967040 }
   0xb   :  { %326 = dma.done.wait [#allocation6], 1024  }
   0xc   :  { %327 = vsyncadd [#allocation6], 4294966272  ;;  %v236_v0 = vld [vmem:[#allocation2 + $0x8] sm:$0xff]  ;;  %v235_v2 = vld [vmem:[#allocation2] sm:$0xff]  ;;  %vm75_vm0 = vcmask 261120   ;;  %s334_s8 = smov [#allocation7]  }
   0xd   :  { %v244_v1 = vld [vmem:[#allocation5 + $0x38] sm:$0xff]  ;;  %85 = vmatpush.bf16.msra.mxu0 %v236_v0  ;;  %v243_v3 = vld [vmem:[#allocation5 + $0x30] sm:$0xff]  ;;  %v242_v5 = vld [vmem:[#allocation5 + $0x28] sm:$0xff]  ;;  %s181_s9 = sshll.u32 %s334_s8, 4  ;;  %s183_s12 = sshll.u32 %s388_s5, 4  ;;  %s182_s9 = int_to_ptr.vmem [resolvable:$true] %s181_s9  ;;  %s184_s12 = int_to_ptr.hbm [resolvable:$true] %s183_s12 }
   0xe   :  { %162 = vmatpush.bf16.msra.mxu1 %v244_v1  ;;  %v54_v4 = vld [vmem:[%s383_s0] sm:$0xf]  ;;  %v241_v6 = vld [vmem:[#allocation5 + $0x20] sm:$0xff]  ;;  %v240_v7 = vld [vmem:[#allocation5 + $0x18] sm:$0xff] }
   0xf   :  { %v239_v8 = vld [vmem:[#allocation5 + $0x10] sm:$0xff]  ;;  %v238_v9 = vld [vmem:[#allocation5 + $0x8] sm:$0xff]  ;;  %v237_v10 = vld [vmem:[#allocation5] sm:$0xff] }
  0x10   :  { %v250_v11 = vld [vmem:[%s385_s2] ss:$0 sm:$0xff] }
  0x11   :  { %86 = vmatpush.bf16.msra.mxu0 %v235_v2  ;;  %v251_v17 = vld [vmem:[%s387_s4] ss:$0 sm:$0xff] }
  0x12   :  { %163 = vmatpush.bf16.msra.mxu1 %v243_v3 }
  0x14   :  { %202 = vmatmul.msk.bf16.vlgmr.msra.gmra.mxu0 %vm75_vm0, %v54_v4 }
  0x16   :  { %164 = vmatpush.bf16.msra.mxu1 %v242_v5 }
  0x1a   :  { %165 = vmatpush.bf16.msra.mxu1 %v241_v6 }
  0x1e   :  { %166 = vmatpush.bf16.msra.mxu1 %v240_v7 }
  0x22   :  { %167 = vmatpush.bf16.msra.mxu1 %v239_v8 }
  0x26   :  { %168 = vmatpush.bf16.msra.mxu1 %v238_v9 }
  0x2a   :  { %169 = vmatpush.bf16.msra.mxu1 %v237_v10 }
  0x91   :  { %v88_v12 = vpop.f32.mrf.mxu0 }
  0x92   :  { %v89_v13 = vadd.f32 %v250_v11, %v88_v12 }
  0x94   :  { %v92_v14 = vmax.f32 %v89_v13, 0.0 }
  0x96   :  { %v93_v15 = vpack.c.bf16 %v92_v14, %v92_v14 }
  0x98   :  { %170 = vmatmul.bf16.vlgmr.msra.gmra.mxu1 %v93_v15 }
  0x99   :  { %v90_v16 = vpop.f32.mrf.mxu0 }
 0x115   :  { %v171_v18 = vpop.f32.mrf.mxu1 }
 0x116   :  { %v172_v19 = vadd.f32 %v251_v17, %v171_v18 }
 0x118   :  { %175 = vst [vmem:[#allocation7] sm:$0xff] %v172_v19 }
 0x119   :  { %186 = dma.vmem_to_hbm [thread:$0]  %s182_s9, 128, %s184_s12, [#allocation4]  }
 0x11d   :  { %v173_v20 = vpop.f32.mrf.mxu1 }
 0x11e   :  { %328 = dma.done.wait [#allocation4], 128  }
 0x11f   :  { %329 = vsyncadd [#allocation4], 4294967168 }
 0x120   :  { %191 = vsyncpa [#allocation3], 1 }
 0x121   :  { %192 = vsyncpa [#allocation6], 1 }
 0x122   :  { %193 = vsyncpa [#allocation4], 1 }

</bundles_post_ra>
